<compile_context>
chip_gen: v6e
topology: v6e:2x2x1
jax: 0.10.0
libtpu: 0.0.40
codegen_flags: <defaults>
</compile_context>

<pallas_src>
import jax
import jax.numpy as jnp
from jax.experimental import pallas as pl
from jax.experimental.pallas import tpu as pltpu


def _round_up(x, m):
    return (x + m - 1) // m * m


def _make_generator_kernel(n_ct, n_kt):
    """Kernel closure over the static class-tile / k-tile counts."""

    def kernel(x_ref, w_ref, b_ref, o_ref, acc_ref, logits_ref):
        # x_ref: (TR, TK)   w_ref: (TK, TC)   b_ref: (1, TC)
        # o_ref: (TR, C_pad)  -- resident across the class / k grid axes
        # acc_ref: (TR, TC) f32 partial-logit accumulator over k tiles
        # logits_ref: (n_ct, TR, TC) f32 staged logits for the current row tile
        j = pl.program_id(1)  # class-tile index
        k = pl.program_id(2)  # dim_model-tile index

        @pl.when(k == 0)
        def _():
            acc_ref[...] = jnp.zeros_like(acc_ref)

        # Native-dtype MXU matmul (bf16 stays bf16), f32 accumulation.
        acc_ref[...] += jnp.dot(
            x_ref[...], w_ref[...], preferred_element_type=jnp.float32
        )

        @pl.when(k == n_kt - 1)
        def _():
            logits_ref[j] = acc_ref[...] + b_ref[...].astype(jnp.float32)

        @pl.when(jnp.logical_and(j == n_ct - 1, k == n_kt - 1))
        def _():
            if n_ct == 1:
                full = logits_ref[0]
            else:
                full = jnp.concatenate(
                    [logits_ref[jj] for jj in range(n_ct)], axis=-1
                )
            m = jnp.max(full, axis=-1, keepdims=True)
            shifted = full - m
            lse = jnp.log(jnp.sum(jnp.exp(shifted), axis=-1, keepdims=True))
            o_ref[...] = (shifted - lse).astype(o_ref.dtype)

    return kernel


def generator_forward(x, w, b, *, tile_rows=None, tile_c=None, tile_k=None):
    """log_softmax(x @ w + b, axis=-1).

    x: (..., dim_model); w: (dim_model, n_classes); b: (n_classes,)
    Returns: (..., n_classes)
    """
    dim_model, n_classes = w.shape
    orig_shape = x.shape
    x2 = x.reshape(-1, dim_model)
    n_rows = x2.shape[0]
    out_dtype = x.dtype

    xb = jnp.dtype(x.dtype).itemsize
    wb = jnp.dtype(w.dtype).itemsize
    bb = jnp.dtype(b.dtype).itemsize
    ob = jnp.dtype(out_dtype).itemsize

    # ---- class (vocab) tile: lane-dense multiple of 128, capped at 2048 ----
    if tile_c is None:
        tile_c = min(2048, _round_up(n_classes, 128))
    c_pad = _round_up(n_classes, tile_c)
    n_ct = c_pad // tile_c

    # ---- k (dim_model) tile: only tile when D is large ----
    if tile_k is None:
        tile_k = dim_model if dim_model <= 2048 else 512
    d_pad = _round_up(dim_model, tile_k)
    n_kt = d_pad // tile_k

    # ---- row tile: MXU-aligned default, shrunk to a VMEM budget (fits v7x) ----
    if tile_rows is None:
        tile_rows = min(256, _round_up(n_rows, 8))

        def vmem_est(tr):
            return (
                2 * tr * tile_k * xb        # x tile (double-buffered)
                + 2 * tile_k * tile_c * wb  # W tile (double-buffered)
                + 2 * tile_c * bb           # bias tile
                + 2 * tr * c_pad * ob       # resident output block
                + tr * tile_c * 4           # f32 accumulator scratch
                + tr * c_pad * 4            # staged f32 logits scratch
            )

        budget = 40 * 1024 * 1024
        while tile_rows > 8 and vmem_est(tile_rows) > budget:
            tile_rows = max(8, (tile_rows // 2) // 8 * 8)
        # TODO(synk): for extreme vocab sizes where even tile_rows=8 overflows
        # the staged-logits scratch, switch to a two-sweep-over-C online
        # log-softmax (recompute logits on the second sweep) instead.

    r_pad = _round_up(n_rows, tile_rows)
    n_rt = r_pad // tile_rows

    # ---- wrapper-side padding: zeros for rows/K (harmless), -1e30 bias for
    #      padded classes so they never influence max / logsumexp. ----
    if r_pad != n_rows or d_pad != dim_model:
        x2 = jnp.pad(x2, ((0, r_pad - n_rows), (0, d_pad - dim_model)))
    w_p = w
    if d_pad != dim_model or c_pad != n_classes:
        w_p = jnp.pad(w, ((0, d_pad - dim_model), (0, c_pad - n_classes)))
    b_p = b
    if c_pad != n_classes:
        b_p = jnp.pad(b, (0, c_pad - n_classes), constant_values=-1e30)
    b_p = b_p.reshape(1, c_pad)

    kernel = _make_generator_kernel(n_ct, n_kt)

    cost = pl.CostEstimate(
        flops=2 * r_pad * d_pad * c_pad,
        transcendentals=r_pad * c_pad,
        bytes_accessed=(
            n_ct * r_pad * d_pad * xb      # x (re-streamed per class tile)
            + n_rt * d_pad * c_pad * wb    # W (streamed once per row tile)
            + r_pad * c_pad * ob           # output
        ),
    )

    vmem_limit = int(
        min(
            48 * 1024 * 1024,
            max(
                32 * 1024 * 1024,
                2
                * (
                    2 * tile_rows * tile_k * xb
                    + 2 * tile_k * tile_c * wb
                    + 2 * tile_rows * c_pad * ob
                    + tile_rows * tile_c * 4
                    + tile_rows * c_pad * 4
                ),
            ),
        )
    )

    out = pl.pallas_call(
        kernel,
        out_shape=jax.ShapeDtypeStruct((r_pad, c_pad), out_dtype),
        grid_spec=pltpu.PrefetchScalarGridSpec(
            num_scalar_prefetch=0,
            grid=(n_rt, n_ct, n_kt),
            in_specs=[
                pl.BlockSpec((tile_rows, tile_k), lambda i, j, k: (i, k)),
                pl.BlockSpec((tile_k, tile_c), lambda i, j, k: (k, j)),
                pl.BlockSpec((1, tile_c), lambda i, j, k: (0, j)),
            ],
            out_specs=pl.BlockSpec((tile_rows, c_pad), lambda i, j, k: (i, 0)),
            scratch_shapes=[
                pltpu.VMEM((tile_rows, tile_c), jnp.float32),
                pltpu.VMEM((n_ct, tile_rows, tile_c), jnp.float32),
            ],
        ),
        compiler_params=pltpu.CompilerParams(
            dimension_semantics=("parallel", "arbitrary", "arbitrary"),
            vmem_limit_bytes=vmem_limit,
        ),
        cost_estimate=cost,
    )(x2, w_p, b_p)

    out = out[:n_rows, :n_classes]
    return out.reshape(*orig_shape[:-1], n_classes)


def init_generator_params(key, dim_model, n_classes, dtype=jnp.float32):
    # Deterministic init mimicking nn.Linear's default (uniform +-1/sqrt(fan_in)).
    # PyTorch stores weight as (n_classes, dim_model); we keep the transposed
    # (dim_model, n_classes) layout so the kernel does x @ W directly.
    k_w, k_b = jax.random.split(key)
    bound = 1.0 / (dim_model ** 0.5)
    w = jax.random.uniform(k_w, (dim_model, n_classes), dtype, -bound, bound)
    b = jax.random.uniform(k_b, (n_classes,), dtype, -bound, bound)
    return w, b


if __name__ == "__main__":
    key = jax.random.PRNGKey(0)
    k_x, k_p = jax.random.split(key)

    batch, seq, dim_model, n_classes = 2, 8, 32, 16
    x = jax.random.normal(k_x, (batch, seq, dim_model), jnp.float32)
    w, b = init_generator_params(k_p, dim_model, n_classes)

    out = generator_forward(x, w, b)
    out = jax.block_until_ready(out)

    # Reference check in plain JAX.
    ref = jax.nn.log_softmax(x @ w + b, axis=-1)
    assert out.shape == (batch, seq, n_classes)
    assert jnp.allclose(out, ref, atol=1e-5, rtol=1e-5)

    print("KERNEL_OK")
</pallas_src>

<mosaic_0001>
module attributes {stable_mosaic.version = 11 : i64} {
  func.func @kernel(%arg0: i32, %arg1: i32, %arg2: i32, %arg3: memref<16x32xf32, #tpu.memory_space<vmem>>, %arg4: memref<32x128xf32, #tpu.memory_space<vmem>>, %arg5: memref<1x128xf32, #tpu.memory_space<vmem>>, %arg6: memref<16x128xf32, #tpu.memory_space<vmem>>, %arg7: memref<16x128xf32, #tpu.memory_space<vmem>>, %arg8: memref<1x16x128xf32, #tpu.memory_space<vmem>>) attributes {dimension_semantics = [#tpu.dimension_semantics<parallel>, #tpu.dimension_semantics<arbitrary>, #tpu.dimension_semantics<arbitrary>], iteration_bounds = array<i64: 1, 1, 1>, scalar_prefetch = 0 : i64, scratch_operands = 2 : i64, tpu.core_type = #tpu.core_type<tc>, window_params = [{transform_indices = @transform_0, window_bounds = array<i64: 16, 32>}, {transform_indices = @transform_1, window_bounds = array<i64: 32, 128>}, {transform_indices = @transform_2, window_bounds = array<i64: 1, 128>}, {transform_indices = @transform_3, window_bounds = array<i64: 16, 128>}]} {
    %c0_i32 = arith.constant 0 : i32
    %0 = arith.cmpi eq, %arg2, %c0_i32 : i32
    %1 = arith.extui %0 : i1 to i32
    %c0_i32_0 = arith.constant 0 : i32
    %2 = arith.cmpi ne, %1, %c0_i32_0 : i32
    scf.if %2 {
      %cst_13 = arith.constant 0.000000e+00 : f32
      %17 = vector.broadcast %cst_13 : f32 to vector<16x128xf32>
      %c0_14 = arith.constant 0 : index
      %c0_15 = arith.constant 0 : index
      %18 = vector.load %arg7[%c0_14, %c0_15] : memref<16x128xf32, #tpu.memory_space<vmem>>, vector<16x128xf32>
      tpu.vector_store %arg7[%c0_14, %c0_15], %17 {strides = array<i32>} : memref<16x128xf32, #tpu.memory_space<vmem>>, vector<16x128xf32>,
    } else {
    }
    %c0 = arith.constant 0 : index
    %c0_1 = arith.constant 0 : index
    %3 = vector.load %arg7[%c0, %c0_1] : memref<16x128xf32, #tpu.memory_space<vmem>>, vector<16x128xf32>
    %c0_2 = arith.constant 0 : index
    %c0_3 = arith.constant 0 : index
    %4 = vector.load %arg3[%c0_2, %c0_3] : memref<16x32xf32, #tpu.memory_space<vmem>>, vector<16x32xf32>
    %c0_4 = arith.constant 0 : index
    %c0_5 = arith.constant 0 : index
    %5 = vector.load %arg4[%c0_4, %c0_5] : memref<32x128xf32, #tpu.memory_space<vmem>>, vector<32x128xf32>
    %cst = arith.constant dense<0.000000e+00> : vector<16x128xf32>
    %6 = tpu.matmul %4, %5, %cst {dimension_numbers = #tpu.dot_dimension_numbers<[1], [0], [0], [1], [0, 0, 1, 1], [], []>} : vector<16x32xf32>, vector<32x128xf32>, vector<16x128xf32> -> vector<16x128xf32>
    %7 = arith.addf %3, %6 : vector<16x128xf32>
    %c0_6 = arith.constant 0 : index
    %c0_7 = arith.constant 0 : index
    %8 = vector.load %arg7[%c0_6, %c0_7] : memref<16x128xf32, #tpu.memory_space<vmem>>, vector<16x128xf32>
    tpu.vector_store %arg7[%c0_6, %c0_7], %7 {strides = array<i32>} : memref<16x128xf32, #tpu.memory_space<vmem>>, vector<16x128xf32>,
    %c0_i32_8 = arith.constant 0 : i32
    %9 = arith.cmpi eq, %arg2, %c0_i32_8 : i32
    %10 = arith.extui %9 : i1 to i32
    %c0_i32_9 = arith.constant 0 : i32
    %11 = arith.cmpi ne, %10, %c0_i32_9 : i32
    scf.if %11 {
      %c0_13 = arith.constant 0 : index
      %c0_14 = arith.constant 0 : index
      %17 = vector.load %arg7[%c0_13, %c0_14] : memref<16x128xf32, #tpu.memory_space<vmem>>, vector<16x128xf32>
      %c0_15 = arith.constant 0 : index
      %c0_16 = arith.constant 0 : index
      %18 = vector.load %arg5[%c0_15, %c0_16] : memref<1x128xf32, #tpu.memory_space<vmem>>, vector<1x128xf32>
      %19 = vector.broadcast %18 : vector<1x128xf32> to vector<16x128xf32>
      %20 = arith.addf %17, %19 : vector<16x128xf32>
      %21 = arith.index_cast %arg1 : i32 to index
      %c0_17 = arith.constant 0 : index
      %c0_18 = arith.constant 0 : index
      %22 = vector.load %arg8[%21, %c0_17, %c0_18] : memref<1x16x128xf32, #tpu.memory_space<vmem>>, vector<1x16x128xf32>
      %23 = vector.shape_cast %22 : vector<1x16x128xf32> to vector<16x128xf32>
      %24 = vector.shape_cast %20 : vector<16x128xf32> to vector<1x16x128xf32>
      tpu.vector_store %arg8[%21, %c0_17, %c0_18], %24 {strides = array<i32>} : memref<1x16x128xf32, #tpu.memory_space<vmem>>, vector<1x16x128xf32>,
    } else {
    }
    %c0_i32_10 = arith.constant 0 : i32
    %12 = arith.cmpi eq, %arg1, %c0_i32_10 : i32
    %c0_i32_11 = arith.constant 0 : i32
    %13 = arith.cmpi eq, %arg2, %c0_i32_11 : i32
    %14 = arith.andi %12, %13 : i1
    %15 = arith.extui %14 : i1 to i32
    %c0_i32_12 = arith.constant 0 : i32
    %16 = arith.cmpi ne, %15, %c0_i32_12 : i32
    scf.if %16 {
      %c0_13 = arith.constant 0 : index
      %c0_14 = arith.constant 0 : index
      %c0_15 = arith.constant 0 : index
      %17 = vector.load %arg8[%c0_13, %c0_14, %c0_15] : memref<1x16x128xf32, #tpu.memory_space<vmem>>, vector<1x16x128xf32>
      %18 = vector.shape_cast %17 : vector<1x16x128xf32> to vector<16x128xf32>
      %cst_16 = arith.constant dense<0xFF800000> : vector<16xf32>
      %19 = vector.multi_reduction <maximumf>, %18, %cst_16 [1] : vector<16x128xf32> to vector<16xf32>
      %20 = vector.shape_cast %19 : vector<16xf32> to vector<16x1xf32>
      %21 = vector.broadcast %20 : vector<16x1xf32> to vector<16x128xf32>
      %22 = arith.subf %18, %21 : vector<16x128xf32>
      %23 = math.exp %22 : vector<16x128xf32>
      %cst_17 = arith.constant dense<0.000000e+00> : vector<16xf32>
      %24 = vector.multi_reduction <add>, %23, %cst_17 [1] : vector<16x128xf32> to vector<16xf32>
      %25 = vector.shape_cast %24 : vector<16xf32> to vector<16x1xf32>
      %26 = math.log %25 : vector<16x1xf32>
      %27 = vector.broadcast %26 : vector<16x1xf32> to vector<16x128xf32>
      %28 = arith.subf %22, %27 : vector<16x128xf32>
      %c0_18 = arith.constant 0 : index
      %c0_19 = arith.constant 0 : index
      %29 = vector.load %arg6[%c0_18, %c0_19] : memref<16x128xf32, #tpu.memory_space<vmem>>, vector<16x128xf32>
      tpu.vector_store %arg6[%c0_18, %c0_19], %28 {strides = array<i32>} : memref<16x128xf32, #tpu.memory_space<vmem>>, vector<16x128xf32>,
    } else {
    }
    return
  }
  func.func @transform_0(%arg0: i32, %arg1: i32, %arg2: i32) -> (i32, i32) {
    %c0_i32 = arith.constant 0 : i32
    return %arg0, %arg2 : i32, i32
  }
  func.func @transform_1(%arg0: i32, %arg1: i32, %arg2: i32) -> (i32, i32) {
    %c0_i32 = arith.constant 0 : i32
    return %arg2, %arg1 : i32, i32
  }
  func.func @transform_2(%arg0: i32, %arg1: i32, %arg2: i32) -> (i32, i32) {
    %c0_i32 = arith.constant 0 : i32
    %c0_i32_0 = arith.constant 0 : i32
    return %c0_i32, %arg1 : i32, i32
  }
  func.func @transform_3(%arg0: i32, %arg1: i32, %arg2: i32) -> (i32, i32) {
    %c0_i32 = arith.constant 0 : i32
    %c0_i32_0 = arith.constant 0 : i32
    return %arg0, %c0_i32 : i32, i32
  }
}

</mosaic_0001>

<bundles_post_ra>
// kernel: tpu_custom_call.1
= control target key start
LH: loop header
LB: loop body
LE: loop exit
PB: predicated region body
PF: predicated region fallthrough
CT: control target
= control target key end

     0   :  { %8 = vsyncpa [#allocation5], 0  ;;  %s355_s0 = inlined_call_operand.hbm [shape: f32[16,32], index: 0, kind: input, shape index: {}]   ;;  %s356_s1 = inlined_call_operand.hbm [shape: f32[32,128], index: 1, kind: input, shape index: {}]   ;;  %s357_s2 = inlined_call_operand.vmem [shape: f32[1,128], index: 2, kind: input, shape index: {}]   ;;  %s358_s3 = inlined_call_operand.hbm [shape: f32[16,128], index: 3, kind: output, shape index: {}]  }
   0x1   :  { %9 = vsyncpa [#allocation8], 0 }
   0x2   :  { %10 = vsyncpa [#allocation6], 0  ;;  %s307_s12 = smov [#allocation4]  }
   0x3   :  { %s16_s13 = sshll.u32 %s307_s12, 4  ;;  %s17_s13 = int_to_ptr.vmem [resolvable:$true] %s16_s13 }
   0x4   :  { %s249_s14 = scalar_lea.vmem %s17_s13, 256  ;;  %p254_p1 = scmp.lt.s32.totalorder %s17_s13, %s17_s13 }
   0x5   :  { %p250_p0 = scmp.ne.s32.totalorder %s17_s13, %s249_s14  ;;  %p255_p2 = scmp.lt.s32.totalorder %s249_s14, %s249_s14 }
   0x7   :  { %p256_p3 = por %p255_p2, %p254_p1 }
   0x9   :  { %p257_p4 = pnand %p256_p3, %p250_p0 }
   0xb   :  { %260 = shalt.err (!%p257_p4)
}
   0xc   :  { %s308_s15 = smov 128   ;;  %s309_s16 = smov 8  }
   0xd   :  { %22 = dma.hbm_to_vmem [thread:$0]  %s355_s0, 256, %s17_s13, [#allocation5], %s308_s15, %s308_s15, %s309_s16  }
   0xe   :  { %s310_s19 = smov [#allocation7]  }
   0xf   :  { %s28_s20 = sshll.u32 %s310_s19, 4  ;;  %s29_s20 = int_to_ptr.vmem [resolvable:$true] %s28_s20 }
  0x10   :  { %s269_s21 = scalar_lea.vmem %s29_s20, 512  ;;  %p274_p6 = scmp.lt.s32.totalorder %s29_s20, %s29_s20 }
  0x11   :  { %p270_p5 = scmp.ne.s32.totalorder %s29_s20, %s269_s21  ;;  %p275_p7 = scmp.lt.s32.totalorder %s269_s21, %s269_s21 }
  0x13   :  { %p276_p8 = por %p275_p7, %p274_p6 }
  0x15   :  { %p277_p9 = pnand %p276_p8, %p270_p5 }
  0x17   :  { %280 = shalt.err (!%p277_p9)
}
  0x18   :  { %34 = dma.hbm_to_vmem [thread:$0]  %s356_s1, 512, %s29_s20, [#allocation8], %s308_s15, %s308_s15, %s309_s16  }
  0x19   :  { %301 = dma.done.wait [#allocation5], 256  }
  0x1a   :  { %302 = vsyncadd [#allocation5], 4294967040 }
  0x1b   :  { %303 = dma.done.wait [#allocation8], 512  }
  0x1c   :  { %304 = vsyncadd [#allocation8], 4294966784  ;;  %vm57_vm0 = vcmask 261120   ;;  %v56_v0 = vld [vmem:[#allocation7 + $0x18] sm:$0xff]  ;;  %v55_v1 = vld [vmem:[#allocation7 + $0x10] sm:$0xff] }
  0x1d   :  { %217 = vmatprep.subr.mxu0 %v56_v0  ;;  %v51_v2 = vld [vmem:[#allocation4] sm:$0xff]  ;;  %v54_v3 = vld [vmem:[#allocation7 + $0x8] sm:$0xff]  ;;  %v53_v4 = vld [vmem:[#allocation7] sm:$0xff] }
  0x1e   :  { %218 = vmatpush3.msra.mxu0 %v56_v0  ;;  %225 = vmatprep.mubr.msk.f32.mxu0 %vm57_vm0, %v51_v2  ;;  %v52_v5 = vld [vmem:[#allocation4 + $0x8] sm:$0xff]  ;;  %v210_v7 = vld [vmem:[%s357_s2] ss:$0 sm:$0xff]  ;;  %s311_s2 = smov [#allocation9]  }
  0x1f   :  { %219 = vmatprep.subr.mxu0 %v55_v1  ;;  %s195_s24 = sshll.u32 %s311_s2, 4  ;;  %s196_s24 = int_to_ptr.vmem [resolvable:$true] %s195_s24 }
  0x20   :  { %220 = vmatpush3.msra.mxu0 %v55_v1  ;;  %s281_s25 = scalar_lea.vmem %s196_s24, 256  ;;  %p286_p11 = scmp.lt.s32.totalorder %s196_s24, %s196_s24 }
  0x21   :  { %221 = vmatprep.subr.mxu0 %v54_v3  ;;  %p282_p10 = scmp.ne.s32.totalorder %s196_s24, %s281_s25  ;;  %p287_p12 = scmp.lt.s32.totalorder %s281_s25, %s281_s25 }
  0x22   :  { %222 = vmatpush3.msra.mxu0 %v54_v3 }
  0x23   :  { %223 = vmatprep.subr.mxu0 %v53_v4  ;;  %p288_p13 = por %p287_p12, %p286_p11 }
  0x24   :  { %224 = vmatpush3.msra.mxu0 %v53_v4 }
  0x25   :  { %226 = vmatmul.mubr.msk.f32.vlgmr.msra.gmra.mxu0 %vm57_vm0, %v52_v5  ;;  %p289_p0 = pnand %p288_p13, %p282_p10 }
  0xe5   :  { %v227_v6 = vpop.f32.mrf.mxu0 }
  0xe6   :  { %v156_v10 = vadd.f32 %v227_v6, %v210_v7 }
  0xe7   :  { %v130_v8 = vpop.f32.mrf.mxu0 }
  0xe8   :  { %v155_v9 = vadd.f32 %v210_v7, %v130_v8 }
  0xea   :  { %168 = vmax.xlane.f32.xlu0 %v155_v9 }
  0xee   :  { %170 = vmax.xlane.f32.xlu0 %v156_v10 }
 0x173   :  { %v169_v11 = vpop.xlane.xlu0 %168 }
 0x174   :  { %v172_v12 = vsub.f32 %v155_v9, %v169_v11 }
 0x176   :  { %v174_v13 = vmul.f32 1.442695, %v172_v12 }
 0x177   :  { %v171_v14 = vpop.xlane.xlu0 %170 }
 0x178   :  { %v173_v15 = vsub.f32 %v156_v10, %v171_v14  ;;  %233 = vpow2.f32 %v174_v13 }
 0x17a   :  { %v176_v16 = vmul.f32 1.442695, %v173_v15 }
 0x17c   :  { %235 = vpow2.f32 %v176_v16 }
 0x185   :  { %v234_v17 = vpop.eup %233 }
 0x186   :  { %178 = vadd.xlane.f32.xlu1 %v234_v17 }
 0x189   :  { %v236_v18 = vpop.eup %235 }
 0x18a   :  { %180 = vadd.xlane.f32.xlu1 %v236_v18 }
 0x20f   :  { %v179_v19 = vpop.xlane.xlu1 %178 }
 0x210   :  { %237 = vlog2.f32 %v179_v19 }
 0x213   :  { %v181_v20 = vpop.xlane.xlu1 %180 }
 0x214   :  { %239 = vlog2.f32 %v181_v20 }
 0x21d   :  { %v238_v21 = vpop.eup %237 }
 0x21e   :  { %v183_v22 = vmul.f32 0.6931472, %v238_v21 }
 0x220   :  { %v186_v23 = vsub.f32 %v172_v12, %v183_v22 }
 0x221   :  { %v240_v24 = vpop.eup %239 }
 0x222   :  { %v185_v25 = vmul.f32 0.6931472, %v240_v24  ;;  %188 = vst [vmem:[#allocation9] sm:$0xff] %v186_v23 }
 0x224   :  { %v187_v26 = vsub.f32 %v173_v15, %v185_v25 }
 0x226   :  { %189 = vst [vmem:[#allocation9 + $0x8] sm:$0xff] %v187_v26 }
 0x227   :  { %292 = shalt.err (!%p289_p0)
}
 0x228   :  { %201 = dma.vmem_to_hbm [thread:$0]  %s196_s24, 256, %s358_s3, [#allocation6], %s308_s15, %s308_s15, %s309_s16  }
 0x229   :  { %305 = dma.done.wait [#allocation6], 256  }
 0x22a   :  { %306 = vsyncadd [#allocation6], 4294967040 }
 0x22b   :  { %205 = vsyncpa [#allocation5], 1 }
 0x22c   :  { %206 = vsyncpa [#allocation8], 1 }
 0x22d   :  { %207 = vsyncpa [#allocation6], 1 }

</bundles_post_ra>
